<compile_context>
chip_gen: v7x
topology: tpu7x:2x2x1
jax: 0.10.0
libtpu: 0.0.40
codegen_flags: <defaults>
</compile_context>

<pallas_src>
import functools

import jax
import jax.numpy as jnp
import numpy as np
from jax import lax
from jax.experimental import pallas as pl
from jax.experimental.pallas import tpu as pltpu


def _round_up(x: int, m: int) -> int:
    return (x + m - 1) // m * m


def _vmem_limit_bytes() -> int:
    """Gen-gated VMEM budget: ~75% of physical, capped at 100 MiB.

    v7x: 64 MiB/TC -> 48 MiB.  v5e/v6e: 128 MiB -> 96-100 MiB (well above the
    32 MiB default scoped limit, so the compiler can actually use the VMEM).
    """
    try:
        cap = int(pltpu.get_tpu_info().vmem_capacity_bytes)
    except Exception:
        cap = 64 * 1024 * 1024          # conservative fallback (v7x per-TC)
    return min((cap * 3) // 4, 100 * 1024 * 1024)


def _bspec(shape, index_map, pipeline_mode=None):
    if pipeline_mode is None:
        return pl.BlockSpec(shape, index_map)
    return pl.BlockSpec(shape, index_map, pipeline_mode=pipeline_mode)


def _dot_xT_w(x_t, w_t):
    # [TM, TK] x [TN, TK] -> [TM, TN], contracting the last dim of BOTH
    # operands (transposed-RHS matmul, native on the MXU -- no W^T copy).
    return lax.dot_general(
        x_t, w_t,
        dimension_numbers=(((1,), (1,)), ((), ())),
        preferred_element_type=jnp.float32,
    )


def _mlin_kernel_single_k(x_ref, w_ref, b_ref, o_ref, *, take_abs, compute_dtype):
    """Whole contraction in one K block: no scratch accumulator, one store."""
    x_t = x_ref[...]
    w_t = jnp.abs(w_ref[...]) if take_abs else w_ref[...]
    if compute_dtype is not None:
        x_t = x_t.astype(compute_dtype)
        w_t = w_t.astype(compute_dtype)
    acc = _dot_xT_w(x_t, w_t)
    o_ref[...] = (acc + jnp.abs(b_ref[...]).astype(jnp.float32)).astype(o_ref.dtype)


def _mlin_kernel_multi_k(x_ref, w_ref, b_ref, o_ref, acc_ref, *,
                         tk, in_features, ragged_k, take_abs, compute_dtype):
    k = pl.program_id(2)

    @pl.when(k == 0)
    def _():
        acc_ref[...] = jnp.zeros_like(acc_ref)

    x_t = x_ref[...]
    w_t = jnp.abs(w_ref[...]) if take_abs else w_ref[...]

    if ragged_k:
        # IN is not a multiple of TK: the last K block overruns the arrays and
        # its VMEM tail is undefined.  Zero the overrun columns of BOTH tiles
        # so their product is exactly 0 -- this replaces the old HBM pad of W.
        rem = in_features - k * tk                      # >= tk except last block
        col = lax.broadcasted_iota(jnp.int32, (1, tk), 1)
        keep = col < rem
        x_t = jnp.where(keep, x_t, jnp.zeros_like(x_t))
        w_t = jnp.where(keep, w_t, jnp.zeros_like(w_t))

    if compute_dtype is not None:
        x_t = x_t.astype(compute_dtype)
        w_t = w_t.astype(compute_dtype)

    acc_ref[...] += _dot_xT_w(x_t, w_t)

    @pl.when(k == pl.num_programs(2) - 1)
    def _():
        o_ref[...] = (acc_ref[...] + jnp.abs(b_ref[...]).astype(jnp.float32)
                      ).astype(o_ref.dtype)


def monotonic_linear(x, weight, bias, *, tm=None, tn=None, tk=None,
                     compute_dtype=None, stream_buffers=2, weight_is_abs=False):
    """x: [B, IN], weight: [OUT, IN], bias: [OUT] -> [B, OUT] (PyTorch semantics)."""
    B, IN = x.shape
    OUT, IN_w = weight.shape
    assert IN == IN_w, (IN, IN_w)
    assert bias.shape == (OUT,), bias.shape

    itemsize = jnp.dtype(x.dtype).itemsize
    sub = {4: 8, 2: 16, 1: 32}.get(itemsize, 8)        # dtype-aware sublane
    MAXTM, MAXTN = 512, 512
    MAXTK = max(512, 4096 // itemsize)                 # 1024 f32 / 2048 bf16 / 4096 i8

    # --- tile selection (no HBM padding of W or x) -------------------------
    TM = tm if tm is not None else min(MAXTM, _round_up(B, sub))

    if tn is not None:
        TN = tn
    elif OUT < 128:
        TN = OUT                                       # full dim (tiny layer)
    else:
        TN = min(MAXTN, _round_up(OUT, 128))           # lane-dense (128-mult)

    if tk is not None:
        TK = tk
    elif IN <= MAXTK:
        TK = IN                                        # single K step
    else:
        TK = MAXTK
        # Prefer a 128-multiple that divides IN exactly (no ragged K block).
        for cand in range(MAXTK, MAXTK // 2 - 1, -128):
            if IN % cand == 0:
                TK = cand
                break

    i_tiles = pl.cdiv(B, TM)
    j_tiles = pl.cdiv(OUT, TN)
    k_tiles = pl.cdiv(IN, TK)
    ragged_k = (k_tiles > 1) and (IN % TK != 0)

    # v7x has 2 TensorCores: guarantee >= 2 blocks along a 'parallel' axis when
    # the batch collapses to a single i tile (harmless on single-TC v5e/v6e).
    if tn is None and i_tiles == 1 and j_tiles == 1 and TN >= 256:
        TN = _round_up((TN + 1) // 2, 128)
        j_tiles = pl.cdiv(OUT, TN)

    b2d = bias.reshape(1, OUT)
    take_abs = not weight_is_abs

    cost = pl.CostEstimate(
        flops=2 * B * IN * OUT,
        transcendentals=0,
        bytes_accessed=(B * IN + OUT * IN + B * OUT + OUT) * itemsize,
    )
    compiler_params = pltpu.CompilerParams(
        dimension_semantics=(("parallel", "parallel") if k_tiles == 1
                             else ("parallel", "parallel", "arbitrary")),
        vmem_limit_bytes=_vmem_limit_bytes(),
    )
    # Sweepable pipeline depth on the streamed operands (default 2 = standard
    # double buffering; 3 can help small-B, W-bandwidth-bound shapes).
    pmode = pl.Buffered(stream_buffers) if stream_buffers and stream_buffers != 2 else None

    if k_tiles == 1:
        kernel = functools.partial(_mlin_kernel_single_k,
                                   take_abs=take_abs, compute_dtype=compute_dtype)
        grid_spec = pltpu.PrefetchScalarGridSpec(
            num_scalar_prefetch=0,
            grid=(i_tiles, j_tiles),
            in_specs=[
                _bspec((TM, TK), lambda i, j: (i, 0), pmode),   # x tile
                _bspec((TN, TK), lambda i, j: (j, 0), pmode),   # W tile
                _bspec((1, TN), lambda i, j: (0, j)),           # bias tile
            ],
            out_specs=pl.BlockSpec((TM, TN), lambda i, j: (i, j)),
        )
    else:
        kernel = functools.partial(_mlin_kernel_multi_k,
                                   tk=TK, in_features=IN, ragged_k=ragged_k,
                                   take_abs=take_abs, compute_dtype=compute_dtype)
        grid_spec = pltpu.PrefetchScalarGridSpec(
            num_scalar_prefetch=0,
            grid=(i_tiles, j_tiles, k_tiles),
            in_specs=[
                _bspec((TM, TK), lambda i, j, k: (i, k), pmode),   # x tile
                _bspec((TN, TK), lambda i, j, k: (j, k), pmode),   # W tile
                _bspec((1, TN), lambda i, j, k: (0, j)),           # bias tile
            ],
            out_specs=pl.BlockSpec((TM, TN), lambda i, j, k: (i, j)),
            scratch_shapes=[pltpu.VMEM((TM, TN), jnp.float32)],
        )

    return pl.pallas_call(
        kernel,
        out_shape=jax.ShapeDtypeStruct((B, OUT), x.dtype),
        grid_spec=grid_spec,
        compiler_params=compiler_params,
        cost_estimate=cost,
    )(x, weight, b2d)


if __name__ == "__main__":
    key = jax.random.PRNGKey(0)
    k1, k2, k3, k4, k5, k6 = jax.random.split(key, 6)

    def ref_np(x, w, b):
        return (np.asarray(x, np.float64) @ np.abs(np.asarray(w, np.float64)).T
                + np.abs(np.asarray(b, np.float64))[None, :])

    # --- Case 1: tiny layer -> single-K fast path (2-D grid, no accumulator).
    B, IN, OUT = 8, 32, 16
    x = jax.random.normal(k1, (B, IN), dtype=jnp.float32)
    w = jax.random.normal(k2, (OUT, IN), dtype=jnp.float32) * (IN ** -0.5)
    b = jax.random.normal(k3, (OUT,), dtype=jnp.float32) * 0.1

    y = jax.block_until_ready(monotonic_linear(x, w, b))
    assert y.shape == (B, OUT)
    r = ref_np(x, w, b)
    assert np.allclose(np.asarray(y, np.float64), r, rtol=1e-4, atol=1e-4), \
        float(np.max(np.abs(np.asarray(y, np.float64) - r)))

    # --- Case 2: ragged-K multi-step path (3-D grid, in-kernel K mask, no pad).
    B2, IN2, OUT2 = 8, 200, 16
    x2 = jax.random.normal(k4, (B2, IN2), dtype=jnp.float32)
    w2 = jax.random.normal(k5, (OUT2, IN2), dtype=jnp.float32) * (IN2 ** -0.5)
    b2 = jax.random.normal(k6, (OUT2,), dtype=jnp.float32) * 0.1

    y2 = jax.block_until_ready(monotonic_linear(x2, w2, b2, tk=128))
    assert y2.shape == (B2, OUT2)
    r2 = ref_np(x2, w2, b2)
    assert np.allclose(np.asarray(y2, np.float64), r2, rtol=5e-4, atol=5e-4), \
        float(np.max(np.abs(np.asarray(y2, np.float64) - r2)))

    print("KERNEL_OK")
</pallas_src>

<mosaic_0001>
module attributes {stable_mosaic.version = 11 : i64} {
  func.func @_mlin_kernel_single_k(%arg0: i32, %arg1: i32, %arg2: memref<8x32xf32, #tpu.memory_space<vmem>>, %arg3: memref<16x32xf32, #tpu.memory_space<vmem>>, %arg4: memref<1x16xf32, #tpu.memory_space<vmem>>, %arg5: memref<8x16xf32, #tpu.memory_space<vmem>>) attributes {dimension_semantics = [#tpu.dimension_semantics<parallel>, #tpu.dimension_semantics<parallel>], iteration_bounds = array<i64: 1, 1>, scalar_prefetch = 0 : i64, scratch_operands = 0 : i64, tpu.core_type = #tpu.core_type<tc>, window_params = [{transform_indices = @transform_0, window_bounds = array<i64: 8, 32>}, {transform_indices = @transform_1, window_bounds = array<i64: 16, 32>}, {transform_indices = @transform_2, window_bounds = array<i64: 1, 16>}, {transform_indices = @transform_3, window_bounds = array<i64: 8, 16>}]} {
    %c0 = arith.constant 0 : index
    %c0_0 = arith.constant 0 : index
    %0 = vector.load %arg2[%c0, %c0_0] : memref<8x32xf32, #tpu.memory_space<vmem>>, vector<8x32xf32>
    %c0_1 = arith.constant 0 : index
    %c0_2 = arith.constant 0 : index
    %1 = vector.load %arg3[%c0_1, %c0_2] : memref<16x32xf32, #tpu.memory_space<vmem>>, vector<16x32xf32>
    %2 = math.absf %1 : vector<16x32xf32>
    %cst = arith.constant dense<0.000000e+00> : vector<8x16xf32>
    %3 = tpu.matmul %0, %2, %cst {dimension_numbers = #tpu.dot_dimension_numbers<[1], [1], [0], [0], [0, 0, 1, 0], [], []>} : vector<8x32xf32>, vector<16x32xf32>, vector<8x16xf32> -> vector<8x16xf32>
    %c0_3 = arith.constant 0 : index
    %c0_4 = arith.constant 0 : index
    %4 = vector.load %arg4[%c0_3, %c0_4] : memref<1x16xf32, #tpu.memory_space<vmem>>, vector<1x16xf32>
    %5 = math.absf %4 : vector<1x16xf32>
    %6 = vector.broadcast %5 : vector<1x16xf32> to vector<8x16xf32>
    %7 = arith.addf %3, %6 : vector<8x16xf32>
    %c0_5 = arith.constant 0 : index
    %c0_6 = arith.constant 0 : index
    %8 = vector.load %arg5[%c0_5, %c0_6] : memref<8x16xf32, #tpu.memory_space<vmem>>, vector<8x16xf32>
    tpu.vector_store %arg5[%c0_5, %c0_6], %7 {strides = array<i32>} : memref<8x16xf32, #tpu.memory_space<vmem>>, vector<8x16xf32>,
    return
  }
  func.func @transform_0(%arg0: i32, %arg1: i32) -> (i32, i32) {
    %c0_i32 = arith.constant 0 : i32
    %c0_i32_0 = arith.constant 0 : i32
    return %arg0, %c0_i32 : i32, i32
  }
  func.func @transform_1(%arg0: i32, %arg1: i32) -> (i32, i32) {
    %c0_i32 = arith.constant 0 : i32
    %c0_i32_0 = arith.constant 0 : i32
    return %arg1, %c0_i32 : i32, i32
  }
  func.func @transform_2(%arg0: i32, %arg1: i32) -> (i32, i32) {
    %c0_i32 = arith.constant 0 : i32
    %c0_i32_0 = arith.constant 0 : i32
    return %c0_i32, %arg1 : i32, i32
  }
  func.func @transform_3(%arg0: i32, %arg1: i32) -> (i32, i32) {
    %c0_i32 = arith.constant 0 : i32
    return %arg0, %arg1 : i32, i32
  }
}

</mosaic_0001>

<bundles_post_ra>
// kernel: tpu_custom_call.1
= control target key start
LH: loop header
LB: loop body
LE: loop exit
PB: predicated region body
PF: predicated region fallthrough
CT: control target
= control target key end

     0   :  { %8 = vsyncpa [#allocation3], 0  ;;  %s323_s0 = inlined_call_operand.hbm [shape: f32[8,32], index: 0, kind: input, shape index: {}]   ;;  %s324_s1 = inlined_call_operand.hbm [shape: f32[16,32], index: 1, kind: input, shape index: {}]   ;;  %s325_s2 = inlined_call_operand.vmem [shape: f32[1,16], index: 2, kind: input, shape index: {}]   ;;  %s326_s3 = inlined_call_operand.hbm [shape: f32[8,16], index: 3, kind: output, shape index: {}]  }
   0x1   :  { %9 = vsyncpa [#allocation6], 0 }
   0x2   :  { %10 = vsyncpa [#allocation4], 0  ;;  %s249_s12 = smov [#allocation2]   ;;  %s250_s14 = smov [#allocation5]  }
   0x3   :  { %s17_s13 = sshll.u32 %s249_s12, 4  ;;  %s26_s15 = sshll.u32 %s250_s14, 4  ;;  %s18_s13 = int_to_ptr.vmem [resolvable:$true] %s17_s13  ;;  %s277_s15 = int_to_ptr.vmem [resolvable:$true] %s26_s15 }
   0x4   :  { %s177_s18 = scalar_lea.hbm %s323_s0, 128 }
   0x5   :  { %p178_p0 = scmp.ne.s32.totalorder %s323_s0, %s177_s18  ;;  %p181_p1 = scmp.lt.u32.totalorder %s177_s18, %s323_s0 }
   0x7   :  { %p183_p2 = pnand %p181_p1, %p178_p0 }
   0x9   :  { %186 = shalt.err (!%p183_p2)
}
   0xa   :  { %s187_s23 = scalar_lea.vmem %s18_s13, 128  ;;  %p192_p4 = scmp.lt.s32.totalorder %s18_s13, %s18_s13 }
   0xb   :  { %p188_p3 = scmp.ne.s32.totalorder %s18_s13, %s187_s23  ;;  %p193_p5 = scmp.lt.s32.totalorder %s187_s23, %s187_s23 }
   0xd   :  { %p194_p6 = por %p193_p5, %p192_p4 }
   0xf   :  { %p195_p7 = pnand %p194_p6, %p188_p3 }
  0x11   :  { %198 = shalt.err (!%p195_p7)
}
  0x12   :  { %20 = dma.hbm_to_vmem [thread:$0]  %s323_s0, 128, %s18_s13, [#allocation3]  }
  0x13   :  { %s199_s28 = scalar_lea.hbm %s324_s1, 256 }
  0x14   :  { %p200_p8 = scmp.ne.s32.totalorder %s324_s1, %s199_s28  ;;  %p203_p9 = scmp.lt.u32.totalorder %s199_s28, %s324_s1 }
  0x16   :  { %p205_p10 = pnand %p203_p9, %p200_p8 }
  0x18   :  { %208 = shalt.err (!%p205_p10)
}
  0x19   :  { %s209_s6 = scalar_lea.vmem %s277_s15, 256  ;;  %p214_p12 = scmp.lt.s32.totalorder %s277_s15, %s277_s15 }
  0x1a   :  { %p210_p11 = scmp.ne.s32.totalorder %s277_s15, %s209_s6  ;;  %p215_p13 = scmp.lt.s32.totalorder %s209_s6, %s209_s6 }
  0x1c   :  { %p216_p0 = por %p215_p13, %p214_p12 }
  0x1e   :  { %p217_p1 = pnand %p216_p0, %p210_p11 }
  0x20   :  { %220 = shalt.err (!%p217_p1)
}
  0x21   :  { %s251_s0 = smov 128   ;;  %s252_s7 = smov 8  }
  0x22   :  { %32 = dma.hbm_to_vmem [thread:$0]  %s324_s1, 256, %s277_s15, [#allocation6], %s251_s0, %s251_s0, %s252_s7  }
  0x23   :  { %243 = dma.done.wait [#allocation3], 128  }
  0x24   :  { %244 = vsyncadd [#allocation3], 4294967168 }
  0x25   :  { %245 = dma.done.wait [#allocation6], 256  }
  0x26   :  { %246 = vsyncadd [#allocation6], 4294967040  ;;  %v253_v0 = vmov 0.0|0.0   ;;  %vm254_vm0 = vmmov 0   ;;  %v255_v1 = vmov 0.0   ;;  %vm54_vm1 = vcmask 261120  }
  0x27   :  { %165 = vmatprep.subr.bf16.mxu0 %v253_v0  ;;  %162 = vmatprep.mubr.msk.f32.mxu0 %vm254_vm0, %v255_v1  ;;  %v42_v2 = vld [vmem:[#allocation5] sm:$0xff]  ;;  %v43_v3 = vld [vmem:[#allocation5 + $0x8] sm:$0xff]  ;;  %vm167_vm2 = vmpackc.low %vm54_vm1, %vm54_vm1  ;;  %v49_v8 = vlaneseq  ;;  %s256_s11 = smov [#allocation7]   ;;  %vm134_vm3 = vcmask 130048  }
  0x28   :  { %v44_v4 = vand.u32 2147483647, %v42_v2  ;;  %v45_v5 = vand.u32 2147483647, %v43_v3  ;;  %v41_v7 = vld [vmem:[#allocation2] sm:$0xff]  ;;  %s142_s12 = sshll.u32 %s256_s11, 4  ;;  %s143_s12 = int_to_ptr.vmem [resolvable:$true] %s142_s12 }
  0x29   :  { %v50_v9 = vshrl.u32 %v49_v8, 7  ;;  %v46_v10 = vld [vmem:[%s325_s2] sm:$0x1]  ;;  %s221_s13 = scalar_lea.vmem %s143_s12, 128  ;;  %p226_p3 = scmp.lt.s32.totalorder %s143_s12, %s143_s12 }
  0x2a   :  { %v166_v6 = vpack.c.bf16 %v45_v5, %v44_v4  ;;  %v47_v11 = vand.u32 2147483647, %v46_v10  ;;  %p222_p2 = scmp.ne.s32.totalorder %s143_s12, %s221_s13  ;;  %p227_p4 = scmp.lt.s32.totalorder %s221_s13, %s221_s13 }
  0x2b   :  { %v51_v12 = vsub.s32 0, %v50_v9 }
  0x2c   :  { %168 = vmatpush3.bf16.xpose.msk.msra.mxu0 %vm167_vm2, %v166_v6  ;;  %p228_p5 = por %p227_p4, %p226_p3 }
  0x2d   :  { %v52_v13 = vrot.slane %v47_v11, %v51_v12 }
  0x2e   :  { %p229_p6 = pnand %p228_p5, %p222_p2 }
  0x33   :  { %163 = vmatmul.mubr.msk.f32.vlgmr.msra.gmra.mrb[0].mxu0 %vm54_vm1, %v41_v7 }
 0x106   :  { %v130_v14 = vpop.f32.mrb[0].mxu0 }
 0x107   :  { %v131_v15 = vadd.f32 %v130_v14, %v52_v13  ;;  %v164_v16 = vpop.f32.mrb[1].mxu0 }
 0x109   :  { %135 = vst.msk [vmem:[#allocation7] sm:$0xff] %vm134_vm3, %v131_v15 }
 0x10a   :  { %232 = shalt.err (!%p229_p6)
}
 0x10b   :  { %s233_s15 = scalar_lea.hbm %s326_s3, 128 }
 0x10c   :  { %p234_p7 = scmp.ne.s32.totalorder %s326_s3, %s233_s15  ;;  %p237_p8 = scmp.lt.u32.totalorder %s233_s15, %s326_s3 }
 0x10e   :  { %p239_p9 = pnand %p237_p8, %p234_p7 }
 0x110   :  { %242 = shalt.err (!%p239_p9)
}
 0x111   :  { %145 = dma.vmem_to_hbm [thread:$0]  %s143_s12, 128, %s326_s3, [#allocation4]  }
 0x112   :  { %247 = dma.done.wait [#allocation4], 128  }
 0x113   :  { %248 = vsyncadd [#allocation4], 4294967168 }
 0x114   :  { %149 = vsyncpa [#allocation3], 1 }
 0x115   :  { %150 = vsyncpa [#allocation6], 1 }
 0x116   :  { %151 = vsyncpa [#allocation4], 1 }

</bundles_post_ra>
